<compile_context>
chip_gen: v5e
topology: v5e:2x2
jax: 0.10.0
libtpu: 0.0.40
codegen_flags: <defaults>
</compile_context>

<pallas_src>
import jax
import jax.numpy as jnp
from jax.experimental import pallas as pl
from jax.experimental.pallas import tpu as pltpu

LANE = 128


def _round_up(x, m):
    return ((x + m - 1) // m) * m


def dqn_kernel(x_ref, w_ref, b_ref, out_ref):
    """Fused 3-layer MLP on one batch tile.

    x_ref:   [block_b, D] bf16  (batch rows on sublanes, features on lanes)
    w_ref:   [3, D, D]    bf16  (packed W1/W2/W3, resident across the grid)
    b_ref:   [3, 1, D]    f32   (packed b1/b2/b3; epilogue in f32)
    out_ref: [block_b, D] f32   (lane-dense Q-value tile; caller slices action_dim)
    """
    x = x_ref[...]
    # Layer 1: Linear + ReLU  (bf16 MXU inputs, f32 accumulate, f32 epilogue)
    h = jnp.dot(x, w_ref[0], preferred_element_type=jnp.float32)
    h = jnp.maximum(h + b_ref[0], 0.0)
    # Layer 2: Linear + ReLU
    h = jnp.dot(h.astype(jnp.bfloat16), w_ref[1], preferred_element_type=jnp.float32)
    h = jnp.maximum(h + b_ref[1], 0.0)
    # Layer 3: Linear (Q-values), no activation
    q = jnp.dot(h.astype(jnp.bfloat16), w_ref[2], preferred_element_type=jnp.float32)
    out_ref[...] = (q + b_ref[2]).astype(out_ref.dtype)


def dqn_forward(x, w_pack, b_pack, action_dim, *, block_b=None):
    """x: [B, state_dim] float; returns [B, action_dim] f32 Q-values."""
    B, state_dim = x.shape
    _, D, _ = w_pack.shape

    # Batch tile: fill the MXU M dimension; whole (padded) batch in one tile when small.
    if block_b is None:
        block_b = min(512, _round_up(max(B, 1), LANE))
    b_pad = _round_up(max(B, 1), block_b)

    # Zero-pad batch rows and K lanes; cast activations to bf16 for the MXU.
    x_p = jnp.zeros((b_pad, D), jnp.bfloat16)
    x_p = x_p.at[:B, :state_dim].set(x.astype(jnp.bfloat16))

    vmem = pltpu.MemorySpace.VMEM
    out = pl.pallas_call(
        dqn_kernel,
        out_shape=jax.ShapeDtypeStruct((b_pad, D), jnp.float32),
        grid=(b_pad // block_b,),
        in_specs=[
            pl.BlockSpec((block_b, D), lambda i: (i, 0), memory_space=vmem),
            pl.BlockSpec((3, D, D), lambda i: (0, 0, 0), memory_space=vmem),   # resident
            pl.BlockSpec((3, 1, D), lambda i: (0, 0, 0), memory_space=vmem),   # resident
        ],
        out_specs=pl.BlockSpec((block_b, D), lambda i: (i, 0), memory_space=vmem),
        compiler_params=pltpu.CompilerParams(
            dimension_semantics=("parallel",),  # v7x: split batch tiles across both TCs
        ),
    )(x_p, w_pack, b_pack)
    return out[:B, :action_dim]


def init_params(key, state_dim, hidden_dim, action_dim):
    """PyTorch nn.Linear-style init: U[-1/sqrt(fan_in), 1/sqrt(fan_in)] for W and b."""
    ks = jax.random.split(key, 6)

    def linear(kw, kb, fan_in, fan_out):
        bound = 1.0 / jnp.sqrt(float(fan_in))
        w = jax.random.uniform(kw, (fan_in, fan_out), jnp.float32, -bound, bound)
        b = jax.random.uniform(kb, (fan_out,), jnp.float32, -bound, bound)
        return w, b

    w1, b1 = linear(ks[0], ks[1], state_dim, hidden_dim)
    w2, b2 = linear(ks[2], ks[3], hidden_dim, hidden_dim)
    w3, b3 = linear(ks[4], ks[5], hidden_dim, action_dim)
    return {"w1": w1, "b1": b1, "w2": w2, "b2": b2, "w3": w3, "b3": b3}


def pack_params(params, state_dim, hidden_dim, action_dim):
    """Zero-pad every layer to a lane-aligned D x D square and pack into two buffers:
       weights -> [3, D, D] bf16, biases -> [3, 1, D] f32."""
    D = max(_round_up(state_dim, LANE), _round_up(hidden_dim, LANE),
            _round_up(action_dim, LANE))

    def pad_w(w):
        out = jnp.zeros((D, D), jnp.float32)
        return out.at[: w.shape[0], : w.shape[1]].set(w)

    def pad_b(b):
        out = jnp.zeros((D,), jnp.float32)
        return out.at[: b.shape[0]].set(b.reshape(-1))

    w_pack = jnp.stack(
        [pad_w(params["w1"]), pad_w(params["w2"]), pad_w(params["w3"])]
    ).astype(jnp.bfloat16)
    b_pack = jnp.stack(
        [pad_b(params["b1"]), pad_b(params["b2"]), pad_b(params["b3"])]
    ).reshape(3, 1, D).astype(jnp.float32)
    return w_pack, b_pack


if __name__ == "__main__":
    key = jax.random.PRNGKey(0)
    k_x, k_p = jax.random.split(key)

    batch, state_dim, hidden_dim, action_dim = 8, 32, 128, 8
    x = jax.random.normal(k_x, (batch, state_dim), jnp.float32)
    params = init_params(k_p, state_dim, hidden_dim, action_dim)
    w_pack, b_pack = pack_params(params, state_dim, hidden_dim, action_dim)

    q_values = dqn_forward(x, w_pack, b_pack, action_dim)
    jax.block_until_ready(q_values)

    # Pure-JAX reference with the same bf16 rounding of activations/weights (f32 accumulate).
    def ref_fwd(x, p):
        f = lambda a: a.astype(jnp.bfloat16).astype(jnp.float32)
        h = jnp.maximum(f(x) @ f(p["w1"]) + p["b1"], 0.0)
        h = jnp.maximum(f(h) @ f(p["w2"]) + p["b2"], 0.0)
        return f(h) @ f(p["w3"]) + p["b3"]

    ref = ref_fwd(x, params)
    assert q_values.shape == (batch, action_dim)
    assert jnp.allclose(q_values, ref, atol=1e-2, rtol=1e-2), \
        float(jnp.max(jnp.abs(q_values - ref)))

    print("KERNEL_OK")
</pallas_src>

<mosaic_0001>
module attributes {stable_mosaic.version = 11 : i64} {
  func.func @dqn_kernel(%arg0: i32, %arg1: memref<128x128xbf16, #tpu.memory_space<vmem>>, %arg2: memref<3x128x128xbf16, #tpu.memory_space<vmem>>, %arg3: memref<3x1x128xf32, #tpu.memory_space<vmem>>, %arg4: memref<128x128xf32, #tpu.memory_space<vmem>>) attributes {dimension_semantics = [#tpu.dimension_semantics<parallel>], iteration_bounds = array<i64: 1>, scalar_prefetch = 0 : i64, scratch_operands = 0 : i64, tpu.core_type = #tpu.core_type<tc>, window_params = [{transform_indices = @transform_0, window_bounds = array<i64: 128, 128>}, {pipeline_mode = #tpu.pipeline_mode<synchronous>, transform_indices = @transform_1, window_bounds = array<i64: 3, 128, 128>}, {pipeline_mode = #tpu.pipeline_mode<synchronous>, transform_indices = @transform_2, window_bounds = array<i64: 3, 1, 128>}, {transform_indices = @transform_3, window_bounds = array<i64: 128, 128>}]} {
    %c0 = arith.constant 0 : index
    %c0_0 = arith.constant 0 : index
    %0 = vector.load %arg1[%c0, %c0_0] : memref<128x128xbf16, #tpu.memory_space<vmem>>, vector<128x128xbf16>
    %c0_1 = arith.constant 0 : index
    %c0_2 = arith.constant 0 : index
    %c0_3 = arith.constant 0 : index
    %1 = vector.load %arg2[%c0_1, %c0_2, %c0_3] : memref<3x128x128xbf16, #tpu.memory_space<vmem>>, vector<1x128x128xbf16>
    %2 = vector.shape_cast %1 : vector<1x128x128xbf16> to vector<128x128xbf16>
    %cst = arith.constant dense<0.000000e+00> : vector<128x128xf32>
    %3 = tpu.matmul %0, %2, %cst {dimension_numbers = #tpu.dot_dimension_numbers<[1], [0], [0], [1], [0, 0, 1, 1], [], []>} : vector<128x128xbf16>, vector<128x128xbf16>, vector<128x128xf32> -> vector<128x128xf32>
    %c0_4 = arith.constant 0 : index
    %c0_5 = arith.constant 0 : index
    %c0_6 = arith.constant 0 : index
    %4 = vector.load %arg3[%c0_4, %c0_5, %c0_6] : memref<3x1x128xf32, #tpu.memory_space<vmem>>, vector<1x1x128xf32>
    %5 = vector.shape_cast %4 : vector<1x1x128xf32> to vector<1x128xf32>
    %6 = vector.broadcast %5 : vector<1x128xf32> to vector<128x128xf32>
    %7 = arith.addf %3, %6 : vector<128x128xf32>
    %cst_7 = arith.constant 0.000000e+00 : f32
    %8 = vector.broadcast %cst_7 : f32 to vector<128x128xf32>
    %9 = arith.maximumf %7, %8 : vector<128x128xf32>
    %10 = arith.truncf %9 : vector<128x128xf32> to vector<128x128xbf16>
    %c1 = arith.constant 1 : index
    %c0_8 = arith.constant 0 : index
    %c0_9 = arith.constant 0 : index
    %11 = vector.load %arg2[%c1, %c0_8, %c0_9] : memref<3x128x128xbf16, #tpu.memory_space<vmem>>, vector<1x128x128xbf16>
    %12 = vector.shape_cast %11 : vector<1x128x128xbf16> to vector<128x128xbf16>
    %cst_10 = arith.constant dense<0.000000e+00> : vector<128x128xf32>
    %13 = tpu.matmul %10, %12, %cst_10 {dimension_numbers = #tpu.dot_dimension_numbers<[1], [0], [0], [1], [0, 0, 1, 1], [], []>} : vector<128x128xbf16>, vector<128x128xbf16>, vector<128x128xf32> -> vector<128x128xf32>
    %c1_11 = arith.constant 1 : index
    %c0_12 = arith.constant 0 : index
    %c0_13 = arith.constant 0 : index
    %14 = vector.load %arg3[%c1_11, %c0_12, %c0_13] : memref<3x1x128xf32, #tpu.memory_space<vmem>>, vector<1x1x128xf32>
    %15 = vector.shape_cast %14 : vector<1x1x128xf32> to vector<1x128xf32>
    %16 = vector.broadcast %15 : vector<1x128xf32> to vector<128x128xf32>
    %17 = arith.addf %13, %16 : vector<128x128xf32>
    %cst_14 = arith.constant 0.000000e+00 : f32
    %18 = vector.broadcast %cst_14 : f32 to vector<128x128xf32>
    %19 = arith.maximumf %17, %18 : vector<128x128xf32>
    %20 = arith.truncf %19 : vector<128x128xf32> to vector<128x128xbf16>
    %c2 = arith.constant 2 : index
    %c0_15 = arith.constant 0 : index
    %c0_16 = arith.constant 0 : index
    %21 = vector.load %arg2[%c2, %c0_15, %c0_16] : memref<3x128x128xbf16, #tpu.memory_space<vmem>>, vector<1x128x128xbf16>
    %22 = vector.shape_cast %21 : vector<1x128x128xbf16> to vector<128x128xbf16>
    %cst_17 = arith.constant dense<0.000000e+00> : vector<128x128xf32>
    %23 = tpu.matmul %20, %22, %cst_17 {dimension_numbers = #tpu.dot_dimension_numbers<[1], [0], [0], [1], [0, 0, 1, 1], [], []>} : vector<128x128xbf16>, vector<128x128xbf16>, vector<128x128xf32> -> vector<128x128xf32>
    %c2_18 = arith.constant 2 : index
    %c0_19 = arith.constant 0 : index
    %c0_20 = arith.constant 0 : index
    %24 = vector.load %arg3[%c2_18, %c0_19, %c0_20] : memref<3x1x128xf32, #tpu.memory_space<vmem>>, vector<1x1x128xf32>
    %25 = vector.shape_cast %24 : vector<1x1x128xf32> to vector<1x128xf32>
    %26 = vector.broadcast %25 : vector<1x128xf32> to vector<128x128xf32>
    %27 = arith.addf %23, %26 : vector<128x128xf32>
    %c0_21 = arith.constant 0 : index
    %c0_22 = arith.constant 0 : index
    %28 = vector.load %arg4[%c0_21, %c0_22] : memref<128x128xf32, #tpu.memory_space<vmem>>, vector<128x128xf32>
    tpu.vector_store %arg4[%c0_21, %c0_22], %27 {strides = array<i32>} : memref<128x128xf32, #tpu.memory_space<vmem>>, vector<128x128xf32>,
    return
  }
  func.func @transform_0(%arg0: i32) -> (i32, i32) {
    %c0_i32 = arith.constant 0 : i32
    %c0_i32_0 = arith.constant 0 : i32
    return %arg0, %c0_i32 : i32, i32
  }
  func.func @transform_1(%arg0: i32) -> (i32, i32, i32) {
    %c0_i32 = arith.constant 0 : i32
    %c0_i32_0 = arith.constant 0 : i32
    %c0_i32_1 = arith.constant 0 : i32
    %c0_i32_2 = arith.constant 0 : i32
    return %c0_i32, %c0_i32_0, %c0_i32_1 : i32, i32, i32
  }
  func.func @transform_2(%arg0: i32) -> (i32, i32, i32) {
    %c0_i32 = arith.constant 0 : i32
    %c0_i32_0 = arith.constant 0 : i32
    %c0_i32_1 = arith.constant 0 : i32
    %c0_i32_2 = arith.constant 0 : i32
    return %c0_i32, %c0_i32_0, %c0_i32_1 : i32, i32, i32
  }
  func.func @transform_3(%arg0: i32) -> (i32, i32) {
    %c0_i32 = arith.constant 0 : i32
    %c0_i32_0 = arith.constant 0 : i32
    return %arg0, %c0_i32 : i32, i32
  }
}

</mosaic_0001>

<bundles_post_ra>
// kernel: tpu_custom_call.1
= control target key start
LH: loop header
LB: loop body
LE: loop exit
PB: predicated region body
PF: predicated region fallthrough
CT: control target
= control target key end

     0   :  { %8 = vsyncpa [#allocation3], 0  ;;  %s924_s0 = inlined_call_operand.hbm [shape: bf16[128,128], index: 0, kind: input, shape index: {}]   ;;  %s925_s1 = inlined_call_operand.hbm [shape: bf16[3,128,128], index: 1, kind: input, shape index: {}]   ;;  %s926_s2 = inlined_call_operand.hbm [shape: f32[3,1,128], index: 2, kind: input, shape index: {}]   ;;  %s927_s3 = inlined_call_operand.hbm [shape: f32[128,128], index: 3, kind: output, shape index: {}]  }
   0x1   :  { %9 = vsyncpa [#allocation6], 0 }
   0x2   :  { %10 = vsyncpa [#allocation4], 0  ;;  %s28_s14 = sshll.u32 %s925_s1, 4  ;;  %s864_s15 = smov [#allocation5]   ;;  %s29_s14 = int_to_ptr.hbm [resolvable:$true] %s28_s14 }
   0x3   :  { %s30_s16 = sshll.u32 %s864_s15, 4  ;;  %s15_s19 = sshll.u32 %s924_s0, 4  ;;  %s31_s16 = int_to_ptr.vmem [resolvable:$true] %s30_s16  ;;  %s16_s19 = int_to_ptr.hbm [resolvable:$true] %s15_s19 }
   0x4   :  { %s865_s20 = smov 64   ;;  %s866_s21 = smov 4  }
   0x5   :  { %36 = dma.hbm_to_vmem [thread:$0]  %s29_s14, 3072, %s31_s16, [#allocation6], %s865_s20, %s865_s20, %s866_s21  }
   0x6   :  { %s867_s22 = smov [#allocation2]   ;;  %s41_s26 = sshll.u32 %s926_s2, 4  ;;  %s42_s26 = int_to_ptr.hbm [resolvable:$true] %s41_s26 }
   0x7   :  { %s17_s23 = sshll.u32 %s867_s22, 4  ;;  %s868_s1 = smov [#allocation7]   ;;  %s18_s23 = int_to_ptr.vmem [resolvable:$true] %s17_s23 }
   0x8   :  { %23 = dma.hbm_to_vmem [thread:$0]  %s16_s19, 1024, %s18_s23, [#allocation3], %s865_s20, %s865_s20, %s866_s21  }
   0x9   :  { %s43_s27 = sshll.u32 %s868_s1, 4  ;;  %s869_s28 = smov 16   ;;  %s44_s27 = int_to_ptr.vmem [resolvable:$true] %s43_s27 }
   0xa   :  { %s870_s29 = smov 1  }
   0xb   :  { %49 = dma.hbm_to_vmem [thread:$0]  %s42_s26, 48, %s44_s27, [#allocation6], %s869_s28, %s869_s28, %s870_s29  }
   0xc   :  { %858 = dma.done.wait [#allocation3], 1024  }
   0xd   :  { %859 = vsyncadd [#allocation3], 4294966272 }
   0xe   :  { %860 = dma.done.wait [#allocation6], 3120  }
   0xf   :  { %861 = vsyncadd [#allocation6], 4294964176  ;;  %v708_v0 = vld [vmem:[#allocation5 + $0x38] sm:$0xff]  ;;  %v707_v1 = vld [vmem:[#allocation5 + $0x30] sm:$0xff]  ;;  %s871_s0 = smov [#allocation8]   ;;  %s551_s5 = sshll.u32 %s927_s3, 4  ;;  %s552_s5 = int_to_ptr.hbm [resolvable:$true] %s551_s5 }
  0x10   :  { %194 = vmatpush.bf16.msra.mxu0 %v708_v0  ;;  %725 = vmatpush.bf16.msra.mxu3 %v708_v0  ;;  %v706_v2 = vld [vmem:[#allocation5 + $0x28] sm:$0xff]  ;;  %v705_v3 = vld [vmem:[#allocation5 + $0x20] sm:$0xff]  ;;  %v704_v4 = vld [vmem:[#allocation5 + $0x18] sm:$0xff]  ;;  %s549_s2 = sshll.u32 %s871_s0, 4  ;;  %s872_s6 = smov 128   ;;  %s550_s2 = int_to_ptr.vmem [resolvable:$true] %s549_s2 }
  0x11   :  { %v703_v5 = vld [vmem:[#allocation5 + $0x10] sm:$0xff]  ;;  %v702_v6 = vld [vmem:[#allocation5 + $0x8] sm:$0xff]  ;;  %v701_v7 = vld [vmem:[#allocation5] sm:$0xff]  ;;  %s873_s7 = smov 8  }
  0x12   :  { %v693_v8 = vld [vmem:[#allocation2] sm:$0xff]  ;;  %v699_v9 = vld [vmem:[#allocation2 + $0x30] sm:$0xff]  ;;  %v694_v10 = vld [vmem:[#allocation2 + $0x8] sm:$0xff] }
  0x13   :  { %v700_v11 = vld [vmem:[#allocation2 + $0x38] sm:$0xff]  ;;  %v695_v12 = vld [vmem:[#allocation2 + $0x10] sm:$0xff]  ;;  %v714_v16 = vld [vmem:[#allocation5 + $0x68] sm:$0xff] }
  0x14   :  { %195 = vmatpush.bf16.msra.mxu0 %v707_v1  ;;  %726 = vmatpush.bf16.msra.mxu3 %v707_v1  ;;  %v696_v13 = vld [vmem:[#allocation2 + $0x18] sm:$0xff]  ;;  %v715_v15 = vld [vmem:[#allocation5 + $0x70] sm:$0xff]  ;;  %v713_v17 = vld [vmem:[#allocation5 + $0x60] sm:$0xff] }
  0x15   :  { %v716_v14 = vld [vmem:[#allocation5 + $0x78] sm:$0xff]  ;;  %v697_v18 = vld [vmem:[#allocation2 + $0x20] sm:$0xff]  ;;  %v698_v19 = vld [vmem:[#allocation2 + $0x28] sm:$0xff] }
  0x16   :  { %337 = vmatpush.bf16.msra.mxu1 %v716_v14  ;;  %v712_v20 = vld [vmem:[#allocation5 + $0x58] sm:$0xff]  ;;  %v711_v21 = vld [vmem:[#allocation5 + $0x50] sm:$0xff]  ;;  %v710_v22 = vld [vmem:[#allocation5 + $0x48] sm:$0xff] }
  0x17   :  { %v709_v23 = vld [vmem:[#allocation5 + $0x40] sm:$0xff] }
  0x18   :  { %196 = vmatpush.bf16.msra.mxu0 %v706_v2  ;;  %727 = vmatpush.bf16.msra.mxu3 %v706_v2  ;;  %v903_v25 = vld [vmem:[#allocation7] ss:$0 sm:$0xff] }
  0x1a   :  { %338 = vmatpush.bf16.msra.mxu1 %v715_v15 }
  0x1c   :  { %197 = vmatpush.bf16.msra.mxu0 %v705_v3  ;;  %728 = vmatpush.bf16.msra.mxu3 %v705_v3  ;;  %v724_v3 = vld [vmem:[#allocation5 + $0xb8] sm:$0xff] }
  0x1d   :  { %480 = vmatpush.bf16.msra.mxu2 %v724_v3 }
  0x1e   :  { %339 = vmatpush.bf16.msra.mxu1 %v714_v16 }
  0x20   :  { %198 = vmatpush.bf16.msra.mxu0 %v704_v4  ;;  %729 = vmatpush.bf16.msra.mxu3 %v704_v4 }
  0x22   :  { %340 = vmatpush.bf16.msra.mxu1 %v713_v17 }
  0x24   :  { %199 = vmatpush.bf16.msra.mxu0 %v703_v5  ;;  %730 = vmatpush.bf16.msra.mxu3 %v703_v5  ;;  %v723_v5 = vld [vmem:[#allocation5 + $0xb0] sm:$0xff] }
  0x25   :  { %481 = vmatpush.bf16.msra.mxu2 %v723_v5 }
  0x26   :  { %341 = vmatpush.bf16.msra.mxu1 %v712_v20 }
  0x28   :  { %200 = vmatpush.bf16.msra.mxu0 %v702_v6  ;;  %731 = vmatpush.bf16.msra.mxu3 %v702_v6  ;;  %v722_v6 = vld [vmem:[#allocation5 + $0xa8] sm:$0xff] }
  0x29   :  { %482 = vmatpush.bf16.msra.mxu2 %v722_v6 }
  0x2a   :  { %342 = vmatpush.bf16.msra.mxu1 %v711_v21 }
  0x2c   :  { %201 = vmatpush.bf16.msra.mxu0 %v701_v7  ;;  %732 = vmatpush.bf16.msra.mxu3 %v701_v7 }
  0x2e   :  { %343 = vmatpush.bf16.msra.mxu1 %v710_v22 }
  0x2f   :  { %202 = vmatmul.bf16.vlgmr.msra.gmra.mxu0 %v693_v8  ;;  %232 = vmatmul.bf16.vlgmr.msra.gmra.mxu3 %v699_v9 }
  0x30   :  { %733 = vmatpush.bf16.msrb.mxu3 %v716_v14 }
  0x32   :  { %344 = vmatpush.bf16.msra.mxu1 %v709_v23 }
  0x34   :  { %734 = vmatpush.bf16.msrb.mxu3 %v715_v15 }
  0x38   :  { %735 = vmatpush.bf16.msrb.mxu3 %v714_v16 }
  0x3c   :  { %736 = vmatpush.bf16.msrb.mxu3 %v713_v17 }
  0x3f   :  { %207 = vmatmul.bf16.gmra.mxu0 %v694_v10  ;;  %237 = vmatmul.bf16.gmra.mxu3 %v700_v11  ;;  %v721_v10 = vld [vmem:[#allocation5 + $0xa0] sm:$0xff] }
  0x40   :  { %737 = vmatpush.bf16.msrb.mxu3 %v712_v20  ;;  %483 = vmatpush.bf16.msra.mxu2 %v721_v10 }
  0x44   :  { %738 = vmatpush.bf16.msrb.mxu3 %v711_v21  ;;  %v720_v21 = vld [vmem:[#allocation5 + $0x98] sm:$0xff] }
  0x45   :  { %484 = vmatpush.bf16.msra.mxu2 %v720_v21 }
  0x48   :  { %739 = vmatpush.bf16.msrb.mxu3 %v710_v22  ;;  %v719_v22 = vld [vmem:[#allocation5 + $0x90] sm:$0xff] }
  0x49   :  { %485 = vmatpush.bf16.msra.mxu2 %v719_v22 }
  0x4c   :  { %740 = vmatpush.bf16.msrb.mxu3 %v709_v23  ;;  %v718_v23 = vld [vmem:[#allocation5 + $0x88] sm:$0xff] }
  0x4d   :  { %486 = vmatpush.bf16.msra.mxu2 %v718_v23 }
  0x4f   :  { %212 = vmatmul.bf16.gmra.mxu0 %v695_v12 }
  0x50   :  { %741 = vmatpush.bf16.msra.mxu3 %v724_v3 }
  0x54   :  { %742 = vmatpush.bf16.msra.mxu3 %v723_v5 }
  0x58   :  { %743 = vmatpush.bf16.msra.mxu3 %v722_v6 }
  0x5c   :  { %744 = vmatpush.bf16.msra.mxu3 %v721_v10 }
  0x5f   :  { %217 = vmatmul.bf16.gmra.mxu0 %v696_v13 }
  0x60   :  { %745 = vmatpush.bf16.msra.mxu3 %v720_v21 }
  0x64   :  { %746 = vmatpush.bf16.msra.mxu3 %v719_v22 }
  0x68   :  { %747 = vmatpush.bf16.msra.mxu3 %v718_v23 }
  0x6f   :  { %222 = vmatmul.bf16.gmra.mxu0 %v697_v18 }
  0x7f   :  { %227 = vmatmul.bf16.gmra.mxu0 %v698_v19 }
  0xac   :  { %v203_v24 = vpop.f32.mrf.mxu0 }
  0xad   :  { %v204_v27 = vadd.f32 %v903_v25, %v203_v24  ;;  %v717_v24 = vld [vmem:[#allocation5 + $0x80] sm:$0xff] }
  0xae   :  { %487 = vmatpush.bf16.msra.mxu2 %v717_v24  ;;  %748 = vmatpush.bf16.msra.mxu3 %v717_v24 }
  0xaf   :  { %v243_v30 = vmax.f32 %v204_v27, 0.0  ;;  %v760_v27 = vld [vmem:[#allocation7 + $0x1] ss:$0 sm:$0xff] }
  0xb2   :  { %v233_v26 = vpop.f32.mrf.mxu3 }
  0xb3   :  { %v234_v32 = vadd.f32 %v903_v25, %v233_v26 }
  0xb4   :  { %v205_v28 = vpop.f32.mrf.mxu0 }
  0xb5   :  { %v206_v29 = vadd.f32 %v903_v25, %v205_v28  ;;  %v255_v35 = vmax.f32 %v234_v32, 0.0 }
  0xb7   :  { %v244_v31 = vmax.f32 %v206_v29, 0.0 }
  0xb9   :  { %v259_v33 = vpack.c.bf16 %v244_v31, %v243_v30 }
  0xba   :  { %v235_v34 = vpop.f32.mrf.mxu3 }
  0xbb   :  { %345 = vmatmul.bf16.vlgmr.msra.gmra.mxu1 %v259_v33  ;;  %v236_v36 = vadd.f32 %v903_v25, %v235_v34 }
  0xbc   :  { %v208_v37 = vpop.f32.mrf.mxu0 }
  0xbd   :  { %v256_v38 = vmax.f32 %v236_v36, 0.0  ;;  %v209_v41 = vadd.f32 %v903_v25, %v208_v37 }
  0xbf   :  { %v265_v39 = vpack.c.bf16 %v256_v38, %v255_v35  ;;  %v245_v44 = vmax.f32 %v209_v41, 0.0 }
  0xc1   :  { %375 = vmatmul.bf16.vlgmr.msrb.gmra.mxu3 %v265_v39 }
  0xc2   :  { %v238_v40 = vpop.f32.mrf.mxu3 }
  0xc3   :  { %v239_v46 = vadd.f32 %v903_v25, %v238_v40 }
  0xc4   :  { %v210_v42 = vpop.f32.mrf.mxu0 }
  0xc5   :  { %v211_v43 = vadd.f32 %v903_v25, %v210_v42  ;;  %v257_v49 = vmax.f32 %v239_v46, 0.0 }
  0xc7   :  { %v246_v45 = vmax.f32 %v211_v43, 0.0 }
  0xc9   :  { %v260_v47 = vpack.c.bf16 %v246_v45, %v245_v44 }
  0xca   :  { %v240_v48 = vpop.f32.mrf.mxu3 }
  0xcb   :  { %350 = vmatmul.bf16.gmra.mxu1 %v260_v47  ;;  %v241_v50 = vadd.f32 %v903_v25, %v240_v48 }
  0xcc   :  { %v213_v51 = vpop.f32.mrf.mxu0 }
  0xcd   :  { %v258_v52 = vmax.f32 %v241_v50, 0.0  ;;  %v214_v54 = vadd.f32 %v903_v25, %v213_v51 }
  0xcf   :  { %v266_v53 = vpack.c.bf16 %v258_v52, %v257_v49  ;;  %v247_v57 = vmax.f32 %v214_v54, 0.0 }
  0xd1   :  { %380 = vmatmul.bf16.gmra.mxu3 %v266_v53 }
  0xd4   :  { %v215_v55 = vpop.f32.mrf.mxu0 }
  0xd5   :  { %v216_v56 = vadd.f32 %v903_v25, %v215_v55 }
  0xd7   :  { %v248_v58 = vmax.f32 %v216_v56, 0.0 }
  0xd9   :  { %v261_v59 = vpack.c.bf16 %v248_v58, %v247_v57 }
  0xdb   :  { %355 = vmatmul.bf16.gmra.mxu1 %v261_v59 }
  0xdc   :  { %v218_v60 = vpop.f32.mrf.mxu0 }
  0xdd   :  { %v219_v61 = vadd.f32 %v903_v25, %v218_v60 }
  0xdf   :  { %v249_v0 = vmax.f32 %v219_v61, 0.0 }
  0xe4   :  { %v220_v62 = vpop.f32.mrf.mxu0 }
  0xe5   :  { %v221_v63 = vadd.f32 %v903_v25, %v220_v62 }
  0xe7   :  { %v250_v1 = vmax.f32 %v221_v63, 0.0 }
  0xe9   :  { %v262_v2 = vpack.c.bf16 %v250_v1, %v249_v0 }
  0xeb   :  { %360 = vmatmul.bf16.gmra.mxu1 %v262_v2 }
  0xec   :  { %v223_v4 = vpop.f32.mrf.mxu0 }
  0xed   :  { %v224_v7 = vadd.f32 %v903_v25, %v223_v4 }
  0xef   :  { %v251_v11 = vmax.f32 %v224_v7, 0.0 }
  0xf4   :  { %v225_v8 = vpop.f32.mrf.mxu0 }
  0xf5   :  { %v226_v9 = vadd.f32 %v903_v25, %v225_v8 }
  0xf7   :  { %v252_v12 = vmax.f32 %v226_v9, 0.0 }
  0xf9   :  { %v263_v13 = vpack.c.bf16 %v252_v12, %v251_v11 }
  0xfb   :  { %365 = vmatmul.bf16.gmra.mxu1 %v263_v13 }
  0xfc   :  { %v228_v14 = vpop.f32.mrf.mxu0 }
  0xfd   :  { %v229_v15 = vadd.f32 %v903_v25, %v228_v14 }
  0xff   :  { %v253_v18 = vmax.f32 %v229_v15, 0.0 }
 0x104   :  { %v230_v16 = vpop.f32.mrf.mxu0 }
 0x105   :  { %v231_v17 = vadd.f32 %v903_v25, %v230_v16 }
 0x107   :  { %v254_v19 = vmax.f32 %v231_v17, 0.0 }
 0x109   :  { %v264_v20 = vpack.c.bf16 %v254_v19, %v253_v18  ;;  %v761_v18 = vld [vmem:[#allocation7 + $0x2] ss:$0 sm:$0xff] }
 0x10b   :  { %370 = vmatmul.bf16.gmra.mxu1 %v264_v20 }
 0x138   :  { %v346_v26 = vpop.f32.mrf.mxu1 }
 0x139   :  { %v347_v28 = vadd.f32 %v760_v27, %v346_v26 }
 0x13b   :  { %v386_v30 = vmax.f32 %v347_v28, 0.0 }
 0x140   :  { %v348_v25 = vpop.f32.mrf.mxu1 }
 0x141   :  { %v349_v29 = vadd.f32 %v760_v27, %v348_v25 }
 0x143   :  { %v387_v31 = vmax.f32 %v349_v29, 0.0 }
 0x144   :  { %v376_v32 = vpop.f32.mrf.mxu3 }
 0x145   :  { %v402_v33 = vpack.c.bf16 %v387_v31, %v386_v30  ;;  %v377_v35 = vadd.f32 %v760_v27, %v376_v32 }
 0x147   :  { %488 = vmatmul.bf16.vlgmr.msra.gmra.mxu2 %v402_v33  ;;  %v398_v37 = vmax.f32 %v377_v35, 0.0 }
 0x148   :  { %v351_v34 = vpop.f32.mrf.mxu1 }
 0x149   :  { %v352_v39 = vadd.f32 %v760_v27, %v351_v34 }
 0x14b   :  { %v388_v44 = vmax.f32 %v352_v39, 0.0 }
 0x14c   :  { %v378_v36 = vpop.f32.mrf.mxu3 }
 0x14d   :  { %v379_v38 = vadd.f32 %v760_v27, %v378_v36 }
 0x14f   :  { %v399_v40 = vmax.f32 %v379_v38, 0.0 }
 0x150   :  { %v353_v41 = vpop.f32.mrf.mxu1 }
 0x151   :  { %v354_v42 = vadd.f32 %v760_v27, %v353_v41  ;;  %v408_v43 = vpack.c.bf16 %v399_v40, %v398_v37 }
 0x153   :  { %v389_v45 = vmax.f32 %v354_v42, 0.0  ;;  %518 = vmatmul.bf16.vlgmr.msra.gmra.mxu3 %v408_v43 }
 0x154   :  { %v381_v46 = vpop.f32.mrf.mxu3 }
 0x155   :  { %v403_v47 = vpack.c.bf16 %v389_v45, %v388_v44  ;;  %v382_v49 = vadd.f32 %v760_v27, %v381_v46 }
 0x157   :  { %493 = vmatmul.bf16.gmra.mxu2 %v403_v47  ;;  %v400_v51 = vmax.f32 %v382_v49, 0.0 }
 0x158   :  { %v356_v48 = vpop.f32.mrf.mxu1 }
 0x159   :  { %v357_v53 = vadd.f32 %v760_v27, %v356_v48 }
 0x15b   :  { %v390_v58 = vmax.f32 %v357_v53, 0.0 }
 0x15c   :  { %v383_v50 = vpop.f32.mrf.mxu3 }
 0x15d   :  { %v384_v52 = vadd.f32 %v760_v27, %v383_v50 }
 0x15f   :  { %v401_v54 = vmax.f32 %v384_v52, 0.0 }
 0x160   :  { %v358_v55 = vpop.f32.mrf.mxu1 }
 0x161   :  { %v359_v56 = vadd.f32 %v760_v27, %v358_v55  ;;  %v409_v57 = vpack.c.bf16 %v401_v54, %v400_v51 }
 0x163   :  { %v391_v59 = vmax.f32 %v359_v56, 0.0  ;;  %523 = vmatmul.bf16.gmra.mxu3 %v409_v57 }
 0x165   :  { %v404_v60 = vpack.c.bf16 %v391_v59, %v390_v58 }
 0x167   :  { %498 = vmatmul.bf16.gmra.mxu2 %v404_v60 }
 0x168   :  { %v361_v61 = vpop.f32.mrf.mxu1 }
 0x169   :  { %v362_v62 = vadd.f32 %v760_v27, %v361_v61 }
 0x16b   :  { %v392_v1 = vmax.f32 %v362_v62, 0.0 }
 0x170   :  { %v363_v63 = vpop.f32.mrf.mxu1 }
 0x171   :  { %v364_v0 = vadd.f32 %v760_v27, %v363_v63 }
 0x173   :  { %v393_v2 = vmax.f32 %v364_v0, 0.0 }
 0x175   :  { %v405_v3 = vpack.c.bf16 %v393_v2, %v392_v1 }
 0x177   :  { %503 = vmatmul.bf16.gmra.mxu2 %v405_v3 }
 0x178   :  { %v366_v4 = vpop.f32.mrf.mxu1 }
 0x179   :  { %v367_v5 = vadd.f32 %v760_v27, %v366_v4 }
 0x17b   :  { %v394_v8 = vmax.f32 %v367_v5, 0.0 }
 0x180   :  { %v368_v6 = vpop.f32.mrf.mxu1 }
 0x181   :  { %v369_v7 = vadd.f32 %v760_v27, %v368_v6 }
 0x183   :  { %v395_v9 = vmax.f32 %v369_v7, 0.0 }
 0x185   :  { %v406_v10 = vpack.c.bf16 %v395_v9, %v394_v8 }
 0x187   :  { %508 = vmatmul.bf16.gmra.mxu2 %v406_v10 }
 0x188   :  { %v371_v11 = vpop.f32.mrf.mxu1 }
 0x189   :  { %v372_v12 = vadd.f32 %v760_v27, %v371_v11 }
 0x18b   :  { %v396_v15 = vmax.f32 %v372_v12, 0.0 }
 0x190   :  { %v373_v13 = vpop.f32.mrf.mxu1 }
 0x191   :  { %v374_v14 = vadd.f32 %v760_v27, %v373_v13 }
 0x193   :  { %v397_v16 = vmax.f32 %v374_v14, 0.0 }
 0x195   :  { %v407_v17 = vpack.c.bf16 %v397_v16, %v396_v15 }
 0x197   :  { %513 = vmatmul.bf16.gmra.mxu2 %v407_v17 }
 0x1ca   :  { %v489_v19 = vpop.f32.mrf.mxu2 }
 0x1cb   :  { %v490_v20 = vadd.f32 %v761_v18, %v489_v19 }
 0x1cd   :  { %529 = vst [vmem:[#allocation8] sm:$0xff] %v490_v20 }
 0x1d2   :  { %v491_v21 = vpop.f32.mrf.mxu2 }
 0x1d3   :  { %v492_v22 = vadd.f32 %v761_v18, %v491_v21 }
 0x1d5   :  { %530 = vst [vmem:[#allocation8 + $0x8] sm:$0xff] %v492_v22 }
 0x1d6   :  { %v519_v23 = vpop.f32.mrf.mxu3 }
 0x1d7   :  { %v520_v24 = vadd.f32 %v761_v18, %v519_v23 }
 0x1d9   :  { %541 = vst [vmem:[#allocation8 + $0x60] sm:$0xff] %v520_v24 }
 0x1da   :  { %v494_v26 = vpop.f32.mrf.mxu2 }
 0x1db   :  { %v495_v28 = vadd.f32 %v761_v18, %v494_v26 }
 0x1dd   :  { %531 = vst [vmem:[#allocation8 + $0x10] sm:$0xff] %v495_v28 }
 0x1de   :  { %v521_v25 = vpop.f32.mrf.mxu3 }
 0x1df   :  { %v522_v29 = vadd.f32 %v761_v18, %v521_v25 }
 0x1e1   :  { %542 = vst [vmem:[#allocation8 + $0x68] sm:$0xff] %v522_v29 }
 0x1e2   :  { %v496_v27 = vpop.f32.mrf.mxu2 }
 0x1e3   :  { %v497_v30 = vadd.f32 %v761_v18, %v496_v27 }
 0x1e5   :  { %532 = vst [vmem:[#allocation8 + $0x18] sm:$0xff] %v497_v30 }
 0x1e6   :  { %v524_v31 = vpop.f32.mrf.mxu3 }
 0x1e7   :  { %v525_v32 = vadd.f32 %v761_v18, %v524_v31 }
 0x1e9   :  { %543 = vst [vmem:[#allocation8 + $0x70] sm:$0xff] %v525_v32 }
 0x1ea   :  { %v499_v33 = vpop.f32.mrf.mxu2 }
 0x1eb   :  { %v500_v34 = vadd.f32 %v761_v18, %v499_v33 }
 0x1ed   :  { %533 = vst [vmem:[#allocation8 + $0x20] sm:$0xff] %v500_v34 }
 0x1ee   :  { %v526_v35 = vpop.f32.mrf.mxu3 }
 0x1ef   :  { %v527_v36 = vadd.f32 %v761_v18, %v526_v35 }
 0x1f1   :  { %544 = vst [vmem:[#allocation8 + $0x78] sm:$0xff] %v527_v36 }
 0x1f2   :  { %v501_v37 = vpop.f32.mrf.mxu2 }
 0x1f3   :  { %v502_v38 = vadd.f32 %v761_v18, %v501_v37 }
 0x1f5   :  { %534 = vst [vmem:[#allocation8 + $0x28] sm:$0xff] %v502_v38 }
 0x1fa   :  { %v504_v39 = vpop.f32.mrf.mxu2 }
 0x1fb   :  { %v505_v40 = vadd.f32 %v761_v18, %v504_v39 }
 0x1fd   :  { %535 = vst [vmem:[#allocation8 + $0x30] sm:$0xff] %v505_v40 }
 0x202   :  { %v506_v41 = vpop.f32.mrf.mxu2 }
 0x203   :  { %v507_v42 = vadd.f32 %v761_v18, %v506_v41 }
 0x205   :  { %536 = vst [vmem:[#allocation8 + $0x38] sm:$0xff] %v507_v42 }
 0x20a   :  { %v509_v43 = vpop.f32.mrf.mxu2 }
 0x20b   :  { %v510_v44 = vadd.f32 %v761_v18, %v509_v43 }
 0x20d   :  { %537 = vst [vmem:[#allocation8 + $0x40] sm:$0xff] %v510_v44 }
 0x212   :  { %v511_v45 = vpop.f32.mrf.mxu2 }
 0x213   :  { %v512_v46 = vadd.f32 %v761_v18, %v511_v45 }
 0x215   :  { %538 = vst [vmem:[#allocation8 + $0x48] sm:$0xff] %v512_v46 }
 0x21a   :  { %v514_v47 = vpop.f32.mrf.mxu2 }
 0x21b   :  { %v515_v48 = vadd.f32 %v761_v18, %v514_v47 }
 0x21d   :  { %539 = vst [vmem:[#allocation8 + $0x50] sm:$0xff] %v515_v48 }
 0x222   :  { %v516_v49 = vpop.f32.mrf.mxu2 }
 0x223   :  { %v517_v50 = vadd.f32 %v761_v18, %v516_v49 }
 0x225   :  { %540 = vst [vmem:[#allocation8 + $0x58] sm:$0xff] %v517_v50 }
 0x226   :  { %557 = dma.vmem_to_hbm [thread:$0]  %s550_s2, 2048, %s552_s5, [#allocation4], %s872_s6, %s872_s6, %s873_s7  }
 0x227   :  { %862 = dma.done.wait [#allocation4], 2048  }
 0x228   :  { %863 = vsyncadd [#allocation4], 4294965248 }
 0x229   :  { %562 = vsyncpa [#allocation3], 1 }
 0x22a   :  { %563 = vsyncpa [#allocation6], 1 }
 0x22b   :  { %564 = vsyncpa [#allocation4], 1 }

</bundles_post_ra>
